<compile_context>
chip_gen: v7x
topology: tpu7x:2x2x1
jax: 0.10.0
libtpu: 0.0.40
codegen_flags: <defaults>
</compile_context>

<pallas_src>
import functools

import jax
import jax.numpy as jnp
from jax.experimental import pallas as pl
from jax.experimental.pallas import tpu as pltpu

_MIB = 1024 * 1024


def _round_up(x, m):
    return (x + m - 1) // m * m


# ---------------------------------------------------------------------------
# Kernels
# ---------------------------------------------------------------------------
def _resident_kernel(x_ref, w1_ref, b1_ref, w2_ref, b2_ref, o_ref):
    """Both (D, D) weights resident in VMEM; one batch tile per grid step."""
    x = x_ref[...]                                                  # [TB, D]
    x_f32 = x.astype(jnp.float32)
    h = jnp.dot(x.astype(jnp.bfloat16), w1_ref[...],
                preferred_element_type=jnp.float32)                 # fc1 (MXU)
    h = jnp.maximum(h + b1_ref[...], 0.0)                           # bias+relu (f32 VPU)
    y = jnp.dot(h.astype(jnp.bfloat16), w2_ref[...],
                preferred_element_type=jnp.float32)                 # fc2 (MXU)
    y = jnp.maximum(y + b2_ref[...], 0.0)                           # bias+relu
    o_ref[...] = (y + x_f32).astype(o_ref.dtype)                    # residual add


def _hidden_tiled_kernel(x_ref, w1_ref, b1_ref, w2_ref, b2_ref, o_ref, acc_ref):
    """Hidden-dim tiled: grid=(batch tiles, hidden slabs); f32 acc scratch."""
    j = pl.program_id(1)

    @pl.when(j == 0)
    def _():
        acc_ref[...] = jnp.zeros_like(acc_ref)

    x = x_ref[...]                                                  # [TB, D] (resident across j)
    h = jnp.dot(x.astype(jnp.bfloat16), w1_ref[...],
                preferred_element_type=jnp.float32)                 # [TB, TN] slab of fc1
    h = jnp.maximum(h + b1_ref[...], 0.0)                           # per-slab bias+relu
    acc_ref[...] += jnp.dot(h.astype(jnp.bfloat16), w2_ref[...],
                            preferred_element_type=jnp.float32)     # partial fc2

    @pl.when(j == pl.num_programs(1) - 1)
    def _():
        y = jnp.maximum(acc_ref[...] + b2_ref[...], 0.0)
        o_ref[...] = (y + x.astype(jnp.float32)).astype(o_ref.dtype)


# ---------------------------------------------------------------------------
# Parameter prep (one time)
# ---------------------------------------------------------------------------
def prepare_params(w1, b1, w2, b2, weight_dtype=jnp.bfloat16):
    """PyTorch [D_out, D_in] -> [D_in, D_out] weight_dtype; biases -> (1, Dp) f32.

    Also lane-pads the feature dim to a multiple of 128 so all kernel tiles are
    lane-dense (no-op when D is already 128-aligned).
    """
    D = b1.shape[0]
    Dp = _round_up(D, 128)
    w1_t = jnp.asarray(w1, jnp.float32).T
    w2_t = jnp.asarray(w2, jnp.float32).T
    b1_2d = jnp.asarray(b1, jnp.float32).reshape(1, D)
    b2_2d = jnp.asarray(b2, jnp.float32).reshape(1, D)
    if Dp != D:
        p = Dp - D
        w1_t = jnp.pad(w1_t, ((0, p), (0, p)))
        w2_t = jnp.pad(w2_t, ((0, p), (0, p)))
        b1_2d = jnp.pad(b1_2d, ((0, 0), (0, p)))
        b2_2d = jnp.pad(b2_2d, ((0, 0), (0, p)))
    return (w1_t.astype(weight_dtype), b1_2d, w2_t.astype(weight_dtype), b2_2d)


# ---------------------------------------------------------------------------
# VMEM footprint estimates (bytes)
# ---------------------------------------------------------------------------
def _resident_vmem_bytes(tb, Dp, io_bytes, w_bytes):
    weights = 2 * Dp * Dp * w_bytes + 2 * Dp * 4          # Buffered(1) resident
    io = 2 * 2 * tb * Dp * io_bytes                       # x + out, double-buffered
    interm = 3 * tb * Dp * 4                              # h / y / residual f32 temps
    return weights + io + interm


def _tiled_vmem_bytes(tb, tn, Dp, io_bytes, w_bytes):
    weights = 2 * (Dp * tn + tn * Dp) * w_bytes           # w1/w2 slabs, double-buffered
    biases = 2 * tn * 4 + Dp * 4
    io = 2 * 2 * tb * Dp * io_bytes
    acc = tb * Dp * 4
    interm = 2 * tb * max(tn, Dp) * 4
    return weights + biases + io + acc + interm


def _vmem_limit(estimate):
    # Generous headroom, but never above what v7x physically has per TC.
    return int(min(max(2 * estimate, 32 * _MIB), 56 * _MIB))


# ---------------------------------------------------------------------------
# Wrapper
# ---------------------------------------------------------------------------
@functools.partial(
    jax.jit, static_argnames=("tile_b", "tile_n", "path", "vmem_budget_bytes"))
def residual_block(x, w1_t, b1_2d, w2_t, b2_2d, *,
                   tile_b=512, tile_n=512, path="auto",
                   vmem_budget_bytes=44 * _MIB):
    """x: [B, D] f32 or bf16; w*_t: [Dp, Dp] (pre-transposed); b*_2d: [1, Dp] f32."""
    B, Dx = x.shape
    Dp = w1_t.shape[0]
    assert w1_t.shape == (Dp, Dp) and w2_t.shape == (Dp, Dp)
    assert b1_2d.shape == (1, Dp) and b2_2d.shape == (1, Dp)
    assert Dx <= Dp

    # Lane-pad the feature dim once if the params were padded in prepare_params.
    x_in = x if Dx == Dp else jnp.pad(x, ((0, 0), (0, Dp - Dx)))

    io_bytes = jnp.dtype(x_in.dtype).itemsize
    w_bytes = jnp.dtype(w1_t.dtype).itemsize

    # Batch tile: multiple of 8 sublanes; no host-side batch padding (cdiv grid,
    # OOB rows of the partial last block never touch valid output rows).
    tb = max(8, min(_round_up(tile_b, 8), _round_up(B, 8)))
    # v7x megacore: make sure there are >= 2 "parallel" grid steps when possible.
    if pl.cdiv(B, tb) < 2 and B > 8:
        tb = _round_up(pl.cdiv(B, 2), 8)

    use_resident = (path == "resident") or (
        path == "auto"
        and _resident_vmem_bytes(8, Dp, io_bytes, w_bytes) <= vmem_budget_bytes)

    if use_resident:
        while (_resident_vmem_bytes(tb, Dp, io_bytes, w_bytes) > vmem_budget_bytes
               and tb > 8):
            tb = max(8, _round_up(tb // 2, 8))
        num_b = pl.cdiv(B, tb)
        vmem_est = _resident_vmem_bytes(tb, Dp, io_bytes, w_bytes)
        cost = pl.CostEstimate(
            flops=2 * 2 * B * Dp * Dp,
            transcendentals=0,
            bytes_accessed=(2 * B * Dp * io_bytes      # x in + out
                            + 2 * Dp * Dp * w_bytes    # two weights
                            + 2 * Dp * 4))             # two biases
        out = pl.pallas_call(
            _resident_kernel,
            out_shape=jax.ShapeDtypeStruct((B, Dp), x_in.dtype),
            grid=(num_b,),
            in_specs=[
                pl.BlockSpec((tb, Dp), lambda i: (i, 0)),                 # x: batch-tiled
                pl.BlockSpec((Dp, Dp), lambda i: (0, 0),
                             pipeline_mode=pl.Buffered(1)),               # w1: resident
                pl.BlockSpec((1, Dp), lambda i: (0, 0),
                             pipeline_mode=pl.Buffered(1)),               # b1: resident
                pl.BlockSpec((Dp, Dp), lambda i: (0, 0),
                             pipeline_mode=pl.Buffered(1)),               # w2: resident
                pl.BlockSpec((1, Dp), lambda i: (0, 0),
                             pipeline_mode=pl.Buffered(1)),               # b2: resident
            ],
            out_specs=pl.BlockSpec((tb, Dp), lambda i: (i, 0)),
            compiler_params=pltpu.CompilerParams(
                dimension_semantics=("parallel",),
                vmem_limit_bytes=_vmem_limit(vmem_est),
            ),
            cost_estimate=cost,
        )(x_in, w1_t, b1_2d, w2_t, b2_2d)
    else:
        # Hidden-dim-tiled fallback (large D / tight VMEM, e.g. v7x 64 MiB/TC).
        # tn must be a multiple of 128 that divides Dp (the hidden axis is a
        # reduction for fc2, so partial blocks there are not allowed).
        tn = max(128, (min(tile_n, Dp) // 128) * 128)
        while Dp % tn != 0:
            tn -= 128
        while (_tiled_vmem_bytes(tb, tn, Dp, io_bytes, w_bytes) > vmem_budget_bytes
               and tn > 128):
            tn = max(128, tn // 2)
            while Dp % tn != 0:
                tn -= 128
        while (_tiled_vmem_bytes(tb, tn, Dp, io_bytes, w_bytes) > vmem_budget_bytes
               and tb > 8):
            tb = max(8, _round_up(tb // 2, 8))
        num_b = pl.cdiv(B, tb)
        num_n = Dp // tn
        vmem_est = _tiled_vmem_bytes(tb, tn, Dp, io_bytes, w_bytes)
        cost = pl.CostEstimate(
            flops=2 * 2 * B * Dp * Dp,
            transcendentals=0,
            bytes_accessed=(2 * B * Dp * io_bytes
                            + num_b * 2 * Dp * Dp * w_bytes   # weights re-read per batch tile
                            + 2 * Dp * 4))
        out = pl.pallas_call(
            _hidden_tiled_kernel,
            out_shape=jax.ShapeDtypeStruct((B, Dp), x_in.dtype),
            grid=(num_b, num_n),
            in_specs=[
                pl.BlockSpec((tb, Dp), lambda i, j: (i, 0)),   # x (resident across j)
                pl.BlockSpec((Dp, tn), lambda i, j: (0, j)),   # w1 column slab
                pl.BlockSpec((1, tn), lambda i, j: (0, j)),    # b1 slab
                pl.BlockSpec((tn, Dp), lambda i, j: (j, 0)),   # w2 row slab
                pl.BlockSpec((1, Dp), lambda i, j: (0, 0),
                             pipeline_mode=pl.Buffered(1)),    # b2: resident
            ],
            out_specs=pl.BlockSpec((tb, Dp), lambda i, j: (i, 0)),
            scratch_shapes=[pltpu.VMEM((tb, Dp), jnp.float32)],
            compiler_params=pltpu.CompilerParams(
                dimension_semantics=("parallel", "arbitrary"),
                vmem_limit_bytes=_vmem_limit(vmem_est),
            ),
            cost_estimate=cost,
        )(x_in, w1_t, b1_2d, w2_t, b2_2d)

    return out if Dx == Dp else out[:, :Dx]


# ---------------------------------------------------------------------------
# References
# ---------------------------------------------------------------------------
def residual_block_ref_f32(x, w1, b1, w2, b2):
    """Pure-f32 reference matching the PyTorch module semantics."""
    h = jnp.maximum(x @ w1.T + b1, 0.0)
    y = jnp.maximum(h @ w2.T + b2, 0.0)
    return y + x


def residual_block_ref_bf16(x, w1, b1, w2, b2):
    """Reference mimicking the kernel's bf16-operand / f32-accumulate math."""
    w1t = w1.T.astype(jnp.bfloat16)
    w2t = w2.T.astype(jnp.bfloat16)
    h = jnp.dot(x.astype(jnp.bfloat16), w1t, preferred_element_type=jnp.float32)
    h = jnp.maximum(h + b1, 0.0)
    y = jnp.dot(h.astype(jnp.bfloat16), w2t, preferred_element_type=jnp.float32)
    y = jnp.maximum(y + b2, 0.0)
    return y + x


if __name__ == "__main__":
    B, D = 16, 256  # small demo shape (batch, input_dim)

    key = jax.random.PRNGKey(0)
    kx, kw1, kb1, kw2, kb2 = jax.random.split(key, 5)

    # Deterministic init (mimics nn.Linear uniform(-1/sqrt(D), 1/sqrt(D))).
    bound = 1.0 / jnp.sqrt(jnp.float32(D))
    x = jax.random.normal(kx, (B, D), dtype=jnp.float32)
    w1 = jax.random.uniform(kw1, (D, D), minval=-bound, maxval=bound, dtype=jnp.float32)
    b1 = jax.random.uniform(kb1, (D,), minval=-bound, maxval=bound, dtype=jnp.float32)
    w2 = jax.random.uniform(kw2, (D, D), minval=-bound, maxval=bound, dtype=jnp.float32)
    b2 = jax.random.uniform(kb2, (D,), minval=-bound, maxval=bound, dtype=jnp.float32)

    # One-time parameter prep (transpose + bf16 cast + bias reshape + 128 pad).
    w1_t, b1_2d, w2_t, b2_2d = prepare_params(w1, b1, w2, b2)

    # 1) f32 activation I/O, resident-weight path.
    out = jax.block_until_ready(residual_block(x, w1_t, b1_2d, w2_t, b2_2d))

    # 2) bf16 activation I/O path (halves HBM traffic in the mem-bound regime).
    out_bf16 = jax.block_until_ready(
        residual_block(x.astype(jnp.bfloat16), w1_t, b1_2d, w2_t, b2_2d))

    # 3) Hidden-dim-tiled fallback (auto-selected for large D; forced here to test).
    out_tiled = jax.block_until_ready(
        residual_block(x, w1_t, b1_2d, w2_t, b2_2d, path="tiled", tile_n=128))

    ref_bf16 = residual_block_ref_bf16(x, w1, b1, w2, b2)
    ref_f32 = residual_block_ref_f32(x, w1, b1, w2, b2)

    assert out.shape == (B, D), out.shape
    assert out_bf16.shape == (B, D) and out_bf16.dtype == jnp.bfloat16
    assert out_tiled.shape == (B, D)

    # Tight check against a reference using the same bf16-operand math.
    assert jnp.allclose(out, ref_bf16, atol=1e-3, rtol=1e-3), "mismatch vs bf16 reference"
    # Loose semantic check against the pure-f32 PyTorch-equivalent reference.
    assert jnp.allclose(out, ref_f32, atol=5e-2, rtol=5e-2), "mismatch vs f32 reference"
    # Tiled fallback must agree with the resident path.
    assert jnp.allclose(out_tiled, out, atol=1e-4, rtol=1e-4), "tiled vs resident mismatch"
    # bf16-I/O path: loose check vs f32 reference (input/output quantized to bf16).
    assert jnp.allclose(out_bf16.astype(jnp.float32), ref_f32, atol=1e-1, rtol=1e-1), \
        "bf16 I/O mismatch vs f32 reference"
    print("KERNEL_OK")
</pallas_src>

<mosaic_0001>
module attributes {stable_mosaic.version = 11 : i64} {
  func.func @_resident_kernel(%arg0: i32, %arg1: memref<8x256xf32, #tpu.memory_space<vmem>>, %arg2: memref<256x256xbf16, #tpu.memory_space<vmem>>, %arg3: memref<1x256xf32, #tpu.memory_space<vmem>>, %arg4: memref<256x256xbf16, #tpu.memory_space<vmem>>, %arg5: memref<1x256xf32, #tpu.memory_space<vmem>>, %arg6: memref<8x256xf32, #tpu.memory_space<vmem>>) attributes {dimension_semantics = [#tpu.dimension_semantics<parallel>], iteration_bounds = array<i64: 2>, scalar_prefetch = 0 : i64, scratch_operands = 0 : i64, tpu.core_type = #tpu.core_type<tc>, window_params = [{transform_indices = @transform_0, window_bounds = array<i64: 8, 256>}, {pipeline_mode = #tpu.pipeline_mode<synchronous>, transform_indices = @transform_1, window_bounds = array<i64: 256, 256>}, {pipeline_mode = #tpu.pipeline_mode<synchronous>, transform_indices = @transform_2, window_bounds = array<i64: 1, 256>}, {pipeline_mode = #tpu.pipeline_mode<synchronous>, transform_indices = @transform_3, window_bounds = array<i64: 256, 256>}, {pipeline_mode = #tpu.pipeline_mode<synchronous>, transform_indices = @transform_4, window_bounds = array<i64: 1, 256>}, {transform_indices = @transform_5, window_bounds = array<i64: 8, 256>}]} {
    %c0 = arith.constant 0 : index
    %c0_0 = arith.constant 0 : index
    %0 = vector.load %arg1[%c0, %c0_0] : memref<8x256xf32, #tpu.memory_space<vmem>>, vector<8x256xf32>
    %1 = arith.truncf %0 : vector<8x256xf32> to vector<8x256xbf16>
    %c0_1 = arith.constant 0 : index
    %c0_2 = arith.constant 0 : index
    %2 = vector.load %arg2[%c0_1, %c0_2] : memref<256x256xbf16, #tpu.memory_space<vmem>>, vector<256x256xbf16>
    %cst = arith.constant dense<0.000000e+00> : vector<8x256xf32>
    %3 = tpu.matmul %1, %2, %cst {dimension_numbers = #tpu.dot_dimension_numbers<[1], [0], [0], [1], [0, 0, 1, 1], [], []>} : vector<8x256xbf16>, vector<256x256xbf16>, vector<8x256xf32> -> vector<8x256xf32>
    %c0_3 = arith.constant 0 : index
    %c0_4 = arith.constant 0 : index
    %4 = vector.load %arg3[%c0_3, %c0_4] : memref<1x256xf32, #tpu.memory_space<vmem>>, vector<1x256xf32>
    %5 = vector.broadcast %4 : vector<1x256xf32> to vector<8x256xf32>
    %6 = arith.addf %3, %5 : vector<8x256xf32>
    %cst_5 = arith.constant 0.000000e+00 : f32
    %7 = vector.broadcast %cst_5 : f32 to vector<8x256xf32>
    %8 = arith.maximumf %6, %7 : vector<8x256xf32>
    %9 = arith.truncf %8 : vector<8x256xf32> to vector<8x256xbf16>
    %c0_6 = arith.constant 0 : index
    %c0_7 = arith.constant 0 : index
    %10 = vector.load %arg4[%c0_6, %c0_7] : memref<256x256xbf16, #tpu.memory_space<vmem>>, vector<256x256xbf16>
    %cst_8 = arith.constant dense<0.000000e+00> : vector<8x256xf32>
    %11 = tpu.matmul %9, %10, %cst_8 {dimension_numbers = #tpu.dot_dimension_numbers<[1], [0], [0], [1], [0, 0, 1, 1], [], []>} : vector<8x256xbf16>, vector<256x256xbf16>, vector<8x256xf32> -> vector<8x256xf32>
    %c0_9 = arith.constant 0 : index
    %c0_10 = arith.constant 0 : index
    %12 = vector.load %arg5[%c0_9, %c0_10] : memref<1x256xf32, #tpu.memory_space<vmem>>, vector<1x256xf32>
    %13 = vector.broadcast %12 : vector<1x256xf32> to vector<8x256xf32>
    %14 = arith.addf %11, %13 : vector<8x256xf32>
    %cst_11 = arith.constant 0.000000e+00 : f32
    %15 = vector.broadcast %cst_11 : f32 to vector<8x256xf32>
    %16 = arith.maximumf %14, %15 : vector<8x256xf32>
    %17 = arith.addf %16, %0 : vector<8x256xf32>
    %c0_12 = arith.constant 0 : index
    %c0_13 = arith.constant 0 : index
    %18 = vector.load %arg6[%c0_12, %c0_13] : memref<8x256xf32, #tpu.memory_space<vmem>>, vector<8x256xf32>
    tpu.vector_store %arg6[%c0_12, %c0_13], %17 {strides = array<i32>} : memref<8x256xf32, #tpu.memory_space<vmem>>, vector<8x256xf32>,
    return
  }
  func.func @transform_0(%arg0: i32) -> (i32, i32) {
    %c0_i32 = arith.constant 0 : i32
    %c0_i32_0 = arith.constant 0 : i32
    return %arg0, %c0_i32 : i32, i32
  }
  func.func @transform_1(%arg0: i32) -> (i32, i32) {
    %c0_i32 = arith.constant 0 : i32
    %c0_i32_0 = arith.constant 0 : i32
    %c0_i32_1 = arith.constant 0 : i32
    return %c0_i32, %c0_i32_0 : i32, i32
  }
  func.func @transform_2(%arg0: i32) -> (i32, i32) {
    %c0_i32 = arith.constant 0 : i32
    %c0_i32_0 = arith.constant 0 : i32
    %c0_i32_1 = arith.constant 0 : i32
    return %c0_i32, %c0_i32_0 : i32, i32
  }
  func.func @transform_3(%arg0: i32) -> (i32, i32) {
    %c0_i32 = arith.constant 0 : i32
    %c0_i32_0 = arith.constant 0 : i32
    %c0_i32_1 = arith.constant 0 : i32
    return %c0_i32, %c0_i32_0 : i32, i32
  }
  func.func @transform_4(%arg0: i32) -> (i32, i32) {
    %c0_i32 = arith.constant 0 : i32
    %c0_i32_0 = arith.constant 0 : i32
    %c0_i32_1 = arith.constant 0 : i32
    return %c0_i32, %c0_i32_0 : i32, i32
  }
  func.func @transform_5(%arg0: i32) -> (i32, i32) {
    %c0_i32 = arith.constant 0 : i32
    %c0_i32_0 = arith.constant 0 : i32
    return %arg0, %c0_i32 : i32, i32
  }
}

</mosaic_0001>

<bundles_post_ra>
// kernel: residual_block.1
= control target key start
LH: loop header
LB: loop body
LE: loop exit
PB: predicated region body
PF: predicated region fallthrough
CT: control target
= control target key end

     0   :  { %10 = vsyncpa [#allocation3], 0  ;;  %s1574_s0 = inlined_call_operand.hbm [shape: f32[16,256], index: 0, kind: input, shape index: {}]   ;;  %s1575_s1 = inlined_call_operand.hbm [shape: bf16[256,256], index: 1, kind: input, shape index: {}]   ;;  %s1576_s2 = inlined_call_operand.vmem [shape: f32[1,256], index: 2, kind: input, shape index: {}]   ;;  %s1577_s3 = inlined_call_operand.hbm [shape: bf16[256,256], index: 3, kind: input, shape index: {}]   ;;  %s1578_s4 = inlined_call_operand.vmem [shape: f32[1,256], index: 4, kind: input, shape index: {}]   ;;  %s1579_s5 = inlined_call_operand.hbm [shape: f32[16,256], index: 5, kind: output, shape index: {}]  }
   0x1   :  { %12 = vsyncpa [#allocation3 + $0x1], 0 }
   0x2   :  { %13 = vsyncpa [#allocation6], 0 }
   0x3   :  { %14 = vsyncpa [#allocation4], 0 }
   0x4   :  { %16 = vsyncpa [#allocation4 + $0x1], 0  ;;  %s1321_s18 = smov 0   ;;  %s1323_s19 = smov 0  }
   0x5   :  { %s1325_s20 = smov 0   ;;  %s1327_s21 = smov 0  }
   0x6 LB: > { %s1342_s22 = sadd.s32 4294967295, %s1283_s21   ;;  %s878_s23 = sadd.s32 4294967294, %s1283_s21   ;;  %s1283_s21 = sphi %s1327_s21, %s1599_s21   ;;  %s1279_s20 = sphi %s1325_s20, %s1598_s20   ;;  %s1275_s19 = sphi %s1323_s19, %s1597_s19   ;;  %s1271_s18 = sphi %s1321_s18, %s1596_s18  }
   0x7   : > { %p42_p0 = scmp.ne.s32.totalorder %s1275_s19, %s1271_s18  ;;  %p1580_p1 = scmp.eq.s32.totalorder %s1342_s22, 0 }
   0x8   : > { %p156_p3 = scmp.eq.s32.totalorder %s878_s23, 1  ;;  %p879_p5 = scmp.ge.s32.totalorder %s1283_s21, 1 }
   0x9   : > { %p1351_p4 = por %p1580_p1, %p42_p0  ;;  %p163_p7 = scmp.lt.s32.totalorder %s1283_s21, 3 }
   0xa   : > { %p1356_p6 = por %p156_p3, %p42_p0  ;;  %s1285_s27 = smov [#allocation5]  }
   0xb   : > { %s1583_s24 = scalar_select %p1351_p4, 1, 0 }
   0xc   : > { %s1584_s25 = scalar_select %p1356_p6, 1, 0 }
   0xd   : > { %p1361_p8 = pnand %p879_p5, %p163_p7  ;;  %s175_s28 = sshll.u32 %s1285_s27, 4  ;;  %s1365_s28 = int_to_ptr.vmem [resolvable:$true] %s175_s28 }
   0xe   : > { %s1286_s30 = smov [#allocation7]   ;;  %s1127_s9 = scalar_lea.hbm %s1575_s1, 4096 }
   0xf   : > { %p974_p9 = pneg %p1361_p8  ;;  %s191_s6 = sshll.u32 %s1286_s30, 4  ;;  %s1376_s6 = int_to_ptr.vmem [resolvable:$true] %s191_s6 }
  0x10   : > { %p1128_p12 = scmp.ne.s32.totalorder %s1575_s1, %s1127_s9  ;;  %p1134_p5 = scmp.lt.u32.totalorder %s1127_s9, %s1575_s1 }
  0x11   : > { %p1372_p11 = pnand %p974_p9, %p1580_p1 }
  0x13   : > { %p1129_p13 = pneg %p1372_p11 }
  0x15   : > { %p1130_p0 = pnand %p1129_p13, %p1128_p12 }
  0x17   : > { %p1131_p3 = pneg %p1130_p0 }
  0x19   : > { %p1136_p7 = pnand %p1134_p5, %p1131_p3 }
  0x1b   : > { %1139 = shalt.err (!%p1136_p7)
}
  0x1c   : > { %s1140_s14 = scalar_lea.vmem %s1365_s28, 4096  ;;  %p1148_p2 = scmp.lt.s32.totalorder %s1365_s28, %s1365_s28 }
  0x1d   : > { %p1141_p9 = scmp.ne.s32.totalorder %s1365_s28, %s1140_s14  ;;  %p1149_p12 = scmp.lt.s32.totalorder %s1140_s14, %s1140_s14 }
  0x1f   : > { %p1143_p10 = pnand %p1141_p9, %p1129_p13  ;;  %p1150_p0 = por %p1149_p12, %p1148_p2 }
  0x21   : > { %p1144_p1 = pneg %p1143_p10 }
  0x23   : > { %p1151_p6 = pnand %p1150_p0, %p1144_p1 }
  0x25   : > { %1154 = shalt.err (!%p1151_p6)
}
  0x26   : > { %s1287_s15 = smov 128   ;;  %s1288_s16 = smov 8  }
  0x27   : > { %977 = dma.hbm_to_vmem [thread:$0]  (!%p1372_p11), %s1575_s1, 4096, %s1365_s28, [#allocation6], %s1287_s15, %s1287_s15, %s1288_s16  }
  0x28   : > { %s1155_s7 = scalar_lea.hbm %s1577_s3, 4096 }
  0x29   : > { %p1156_p2 = scmp.ne.s32.totalorder %s1577_s3, %s1155_s7  ;;  %p1162_p10 = scmp.lt.u32.totalorder %s1155_s7, %s1577_s3 }
  0x2b   : > { %p1158_p1 = pnand %p1156_p2, %p1129_p13 }
  0x2d   : > { %p1159_p6 = pneg %p1158_p1 }
  0x2f   : > { %p1164_p3 = pnand %p1162_p10, %p1159_p6 }
  0x31   : > { %1167 = shalt.err (!%p1164_p3)
}
  0x32   : > { %s1168_s28 = scalar_lea.vmem %s1376_s6, 4096  ;;  %p1176_p12 = scmp.lt.s32.totalorder %s1376_s6, %s1376_s6 }
  0x33   : > { %p1169_p5 = scmp.ne.s32.totalorder %s1376_s6, %s1168_s28  ;;  %p1177_p0 = scmp.lt.s32.totalorder %s1168_s28, %s1168_s28 }
  0x35   : > { %p1171_p7 = pnand %p1169_p5, %p1129_p13  ;;  %p1178_p2 = por %p1177_p0, %p1176_p12 }
  0x37   : > { %p1172_p9 = pneg %p1171_p7 }
  0x39   : > { %p1179_p1 = pnand %p1178_p2, %p1172_p9 }
  0x3b   : > { %1182 = shalt.err (!%p1179_p1)
}
  0x3c   : > { %980 = dma.hbm_to_vmem [thread:$0]  (!%p1372_p11), %s1577_s3, 4096, %s1376_s6, [#allocation6], %s1287_s15, %s1287_s15, %s1288_s16  }
  0x3d   : > { %s1431_s14 = sadd.s32 1, %s1283_s21   ;;  %s29_s29 = sadd.s32 1, %s1279_s20 }
  0x3e   : > { %s26_s17 = ssub.s32 %s1283_s21, %s1431_s14  ;;  %p36_p13 = scmp.ne.s32.totalorder %s1279_s20, %s1275_s19 }
  0x3f   : > { %p27_p6 = scmp.eq.s32.totalorder %s26_s17, 0  ;;  %p37_p10 = scmp.eq.s32.totalorder %s1283_s21, 0 }
  0x40   : > { %p1587_p3 = scmp.eq.s32.totalorder %s1342_s22, 1  ;;  %p991_p7 = scmp.lt.s32.totalorder %s1283_s21, 2 }
  0x41   : > { %s1447_s27 = scalar_select %p27_p6, %s1279_s20, %s29_s29  }
  0x42   : > { %p1441_p5 = por %p1587_p3, %p36_p13  ;;  %p38_p9 = por %p37_p10, %p36_p13 }
  0x43   : > { %s208_s30 = sand.u32 1, %s1279_s20   ;;  %s960_s6 = sshll.u32 %s1283_s21, 8 }
  0x44   : > { %s1588_s23 = scalar_select %p1441_p5, 1, 0 }
  0x45   : > { %s883_s7 = sshll.u32 %s208_s30, 4  ;;  %s1454_s8 = scalar_lea.hbm %s1574_s0, %s960_s6 }
  0x46   : > { %s212_s9 = scalar_lea.vmem [#allocation2], %s883_s7  ;;  %p1458_p11 = pnand %p991_p7, %p38_p9 }
  0x47   : > { %s220_s10 = sshll.u32 %s212_s9, 4  ;;  %s209_s28 = scalar_lea.sflag [#allocation3], %s208_s30  ;;  %s1456_s10 = int_to_ptr.vmem [resolvable:$true] %s220_s10 }
  0x48   : > { %s1183_s12 = scalar_lea.hbm %s1454_s8, 256  ;;  %p1185_p0 = pneg %p1458_p11 }
  0x49   : > { %p1184_p12 = scmp.ne.s32.totalorder %s1454_s8, %s1183_s12  ;;  %s1188_s17 = scalar_lea.hbm %s1574_s0, 512 }
  0x4a   : > { %p1189_p13 = scmp.lt.u32.totalorder %s1454_s8, %s1574_s0  ;;  %p1190_p6 = scmp.lt.u32.totalorder %s1188_s17, %s1183_s12 }
  0x4b   : > { %p1186_p2 = pnand %p1185_p0, %p1184_p12  ;;  %p1192_p3 = scmp.lt.u32.totalorder %s1183_s12, %s1454_s8 }
  0x4c   : > { %p1191_p10 = por %p1190_p6, %p1189_p13 }
  0x4d   : > { %p1187_p1 = pneg %p1186_p2 }
  0x4e   : > { %p1193_p7 = por %p1192_p3, %p1191_p10 }
  0x50   : > { %p1194_p9 = pnand %p1193_p7, %p1187_p1 }
  0x52   : > { %1197 = shalt.err (!%p1194_p9)
}
  0x53   : > { %s1198_s30 = scalar_lea.vmem %s1456_s10, 256  ;;  %s1289_s15 = smov [#allocation2]  }
  0x54   : > { %p1199_p12 = scmp.ne.s32.totalorder %s1456_s10, %s1198_s30  ;;  %s1203_s16 = sshll.u32 %s1289_s15, 4  ;;  %s1204_s16 = int_to_ptr.vmem [resolvable:$false] %s1203_s16 }
  0x55   : > { %s1205_s9 = scalar_lea.vmem %s1204_s16, 512  ;;  %p1206_p4 = scmp.lt.s32.totalorder %s1456_s10, %s1204_s16 }
  0x56   : > { %p1201_p2 = pnand %p1199_p12, %p1185_p0  ;;  %p1207_p13 = scmp.lt.s32.totalorder %s1205_s9, %s1198_s30 }
  0x58   : > { %p1202_p5 = pneg %p1201_p2  ;;  %p1208_p6 = por %p1207_p13, %p1206_p4 }
  0x5a   : > { %p1209_p10 = pnand %p1208_p6, %p1202_p5 }
  0x5c   : > { %1212 = shalt.err (!%p1209_p10)
}
  0x5d   : > { %984 = dma.hbm_to_vmem [thread:$0]  (!%p1458_p11), %s1454_s8, 256, %s1456_s10, %s209_s28  }
  0x5e   : > { %229 = sbr.rel (%p1361_p8) target bundleno = 623 (0x26f), region = 40  ;;  %s1490_s12 = sand.u32 (!%p1361_p8), 1, %s1275_s19  }
  0x5f   : > { %s887_s13 = sshll.u32 (!%p1361_p8), %s1490_s12, 4  ;;  %s232_s29 = scalar_lea.sflag (!%p1361_p8), [#allocation3], %s1490_s12 }
  0x60   : > { %s1496_s17 = scalar_lea.vmem (!%p1361_p8), [#allocation2], %s887_s13  ;;  %p1590_p4 = scmp.ne.s32.totalorder (!%p1361_p8), %s1583_s24, 0 }
  0x65   : > { %1258 = dma.done.wait (%p1590_p4), %s232_s29, 256  }
  0x66   : > { %1260 = vsyncadd (%p1590_p4), %s232_s29, 4294967040  ;;  %p1591_p5 = scmp.eq.s32.totalorder %s1342_s22, 0 }
  0x68   : > { %1262 = dma.done.wait (%p1591_p5), [#allocation6], 8192   ;;  %p1592_p8 = pmov %p1591_p5 }
  0x69   : > { %v1031_v0 = vld [vmem:[#allocation5 + $0x4] ss:$8 sps:$4 sm:$0xff]   ;;  %v1033_v1 = vld [vmem:[#allocation5] ss:$8 sps:$4 sm:$0xff]   ;;  %v1034_v2 = vld [vmem:[#allocation5 + $0x14] ss:$8 sps:$4 sm:$0xff]  }
  0x6a   : > { %1264 = vsyncadd (%p1592_p8), [#allocation6], 4294959104  ;;  %478 = vmatprep.subr.bf16.mxu0 %v1031_v0  ;;  %v1036_v3 = vld [vmem:[#allocation5 + $0x10] ss:$8 sps:$4 sm:$0xff]   ;;  %v1037_v4 = vld [vmem:[#allocation5 + $0x24] ss:$8 sps:$4 sm:$0xff]  }
  0x6b   : > { %479 = vmatpush1.bf16.msra.mxu0 %v1033_v1  ;;  %v1039_v5 = vld [vmem:[#allocation5 + $0x20] ss:$8 sps:$4 sm:$0xff]   ;;  %v1040_v6 = vld [vmem:[#allocation5 + $0x34] ss:$8 sps:$4 sm:$0xff]   ;;  %v1042_v7 = vld [vmem:[#allocation5 + $0x30] ss:$8 sps:$4 sm:$0xff]  }
  0x6c   : > { %480 = vmatprep.subr.bf16.mxu0 %v1034_v2  ;;  %v1043_v8 = vld [vmem:[#allocation5 + $0x44] ss:$8 sps:$4 sm:$0xff]   ;;  %v1045_v9 = vld [vmem:[#allocation5 + $0x40] ss:$8 sps:$4 sm:$0xff]   ;;  %v1046_v10 = vld [vmem:[#allocation5 + $0x54] ss:$8 sps:$4 sm:$0xff]  }
  0x6d   : > { %v1048_v11 = vld [vmem:[#allocation5 + $0x50] ss:$8 sps:$4 sm:$0xff]   ;;  %v1049_v12 = vld [vmem:[#allocation5 + $0x64] ss:$8 sps:$4 sm:$0xff]   ;;  %v1051_v13 = vld [vmem:[#allocation5 + $0x60] ss:$8 sps:$4 sm:$0xff]  }
  0x6e   : > { %v1507_v14 = vld [vmem:[%s1496_s17 + $0x8] sm:$0xff]  ;;  %v1512_v54 = vld [vmem:[%s1496_s17] sm:$0xff]  ;;  %s961_s11 = sshll.u32 %s1342_s22, 8  ;;  %s269_s28 = scalar_lea.vmem [#allocation8], %s887_s13 }
  0x6f   : > { %481 = vmatpush1.bf16.msra.mxu0 %v1036_v3  ;;  %v273_v15 = vpack.c.bf16 %v1507_v14, %v1507_v14  ;;  %v1079_v16 = vld [vmem:[#allocation7 + $0x4] ss:$8 sps:$4 sm:$0xff]   ;;  %v1081_v17 = vld [vmem:[#allocation7] ss:$8 sps:$4 sm:$0xff]   ;;  %v1052_v18 = vld [vmem:[#allocation5 + $0x74] ss:$8 sps:$4 sm:$0xff]   ;;  %v272_v56 = vpack.c.bf16 %v1512_v54, %v1512_v54  ;;  %s1530_s15 = scalar_lea.hbm %s1579_s5, %s961_s11 }
  0x70   : > { %482 = vmatprep.subr.bf16.mxu0 %v1037_v4  ;;  %v1082_v19 = vld [vmem:[#allocation7 + $0x14] ss:$8 sps:$4 sm:$0xff]   ;;  %v1054_v20 = vld [vmem:[#allocation5 + $0x70] ss:$8 sps:$4 sm:$0xff]   ;;  %727 = vmatprep.subr.bf16.mxu1 %v1079_v16  ;;  %v1085_v22 = vld [vmem:[#allocation7 + $0x24] ss:$8 sps:$4 sm:$0xff]   ;;  %v308_v4 = vlaneseq }
  0x71   : > { %510 = vmatprep.mubr.bf16.mxu0 %v273_v15  ;;  %728 = vmatpush1.bf16.msra.mxu1 %v1081_v17  ;;  %v1084_v21 = vld [vmem:[#allocation7 + $0x10] ss:$8 sps:$4 sm:$0xff]   ;;  %v1055_v23 = vld [vmem:[#allocation5 + $0x84] ss:$8 sps:$4 sm:$0xff]   ;;  %v1057_v24 = vld [vmem:[#allocation5 + $0x80] ss:$8 sps:$4 sm:$0xff]  }
  0x72   : > { %729 = vmatprep.subr.bf16.mxu1 %v1082_v19  ;;  %v1087_v25 = vld [vmem:[#allocation7 + $0x20] ss:$8 sps:$4 sm:$0xff]   ;;  %v1088_v26 = vld [vmem:[#allocation7 + $0x34] ss:$8 sps:$4 sm:$0xff]   ;;  %v1060_v28 = vld [vmem:[#allocation5 + $0x90] ss:$8 sps:$4 sm:$0xff]  }
  0x73   : > { %483 = vmatpush1.bf16.msra.mxu0 %v1039_v5  ;;  %v1058_v27 = vld [vmem:[#allocation5 + $0x94] ss:$8 sps:$4 sm:$0xff]   ;;  %v1090_v29 = vld [vmem:[#allocation7 + $0x30] ss:$8 sps:$4 sm:$0xff]   ;;  %v1091_v30 = vld [vmem:[#allocation7 + $0x44] ss:$8 sps:$4 sm:$0xff]  }
  0x74   : > { %484 = vmatprep.subr.bf16.mxu0 %v1040_v6  ;;  %v1061_v31 = vld [vmem:[#allocation5 + $0xa4] ss:$8 sps:$4 sm:$0xff]   ;;  %v1063_v32 = vld [vmem:[#allocation5 + $0xa0] ss:$8 sps:$4 sm:$0xff]   ;;  %v1094_v34 = vld [vmem:[#allocation7 + $0x54] ss:$8 sps:$4 sm:$0xff]  }
  0x75   : > { %730 = vmatpush1.bf16.msra.mxu1 %v1084_v21  ;;  %v1093_v33 = vld [vmem:[#allocation7 + $0x40] ss:$8 sps:$4 sm:$0xff]   ;;  %v1064_v35 = vld [vmem:[#allocation5 + $0xb4] ss:$8 sps:$4 sm:$0xff]   ;;  %v1096_v36 = vld [vmem:[#allocation7 + $0x50] ss:$8 sps:$4 sm:$0xff]  }
  0x76   : > { %731 = vmatprep.subr.bf16.mxu1 %v1085_v22  ;;  %v1066_v37 = vld [vmem:[#allocation5 + $0xb0] ss:$8 sps:$4 sm:$0xff]   ;;  %v1097_v38 = vld [vmem:[#allocation7 + $0x64] ss:$8 sps:$4 sm:$0xff]   ;;  %v1099_v40 = vld [vmem:[#allocation7 + $0x60] ss:$8 sps:$4 sm:$0xff]  }
  0x77   : > { %485 = vmatpush1.bf16.msra.mxu0 %v1042_v7  ;;  %v1067_v39 = vld [vmem:[#allocation5 + $0xc4] ss:$8 sps:$4 sm:$0xff]   ;;  %v1069_v41 = vld [vmem:[#allocation5 + $0xc0] ss:$8 sps:$4 sm:$0xff]   ;;  %v1100_v42 = vld [vmem:[#allocation7 + $0x74] ss:$8 sps:$4 sm:$0xff]  }
  0x78   : > { %486 = vmatprep.subr.bf16.mxu0 %v1043_v8  ;;  %v1070_v43 = vld [vmem:[#allocation5 + $0xd4] ss:$8 sps:$4 sm:$0xff]   ;;  %v1102_v44 = vld [vmem:[#allocation7 + $0x70] ss:$8 sps:$4 sm:$0xff]   ;;  %v1103_v46 = vld [vmem:[#allocation7 + $0x84] ss:$8 sps:$4 sm:$0xff]  }
  0x79   : > { %732 = vmatpush1.bf16.msra.mxu1 %v1087_v25  ;;  %v1072_v45 = vld [vmem:[#allocation5 + $0xd0] ss:$8 sps:$4 sm:$0xff]   ;;  %v1073_v47 = vld [vmem:[#allocation5 + $0xe4] ss:$8 sps:$4 sm:$0xff]   ;;  %v1105_v48 = vld [vmem:[#allocation7 + $0x80] ss:$8 sps:$4 sm:$0xff]  }
  0x7a   : > { %733 = vmatprep.subr.bf16.mxu1 %v1088_v26  ;;  %v1075_v49 = vld [vmem:[#allocation5 + $0xe0] ss:$8 sps:$4 sm:$0xff]   ;;  %v1106_v50 = vld [vmem:[#allocation7 + $0x94] ss:$8 sps:$4 sm:$0xff]   ;;  %v1108_v52 = vld [vmem:[#allocation7 + $0x90] ss:$8 sps:$4 sm:$0xff]  }
  0x7b   : > { %487 = vmatpush1.bf16.msra.mxu0 %v1045_v9  ;;  %v1076_v51 = vld [vmem:[#allocation5 + $0xf4] ss:$8 sps:$4 sm:$0xff]   ;;  %v1078_v53 = vld [vmem:[#allocation5 + $0xf0] ss:$8 sps:$4 sm:$0xff]   ;;  %v1109_v55 = vld [vmem:[#allocation7 + $0xa4] ss:$8 sps:$4 sm:$0xff]  }
  0x7c   : > { %488 = vmatprep.subr.bf16.mxu0 %v1046_v10  ;;  %v1111_v57 = vld [vmem:[#allocation7 + $0xa0] ss:$8 sps:$4 sm:$0xff]   ;;  %v1112_v58 = vld [vmem:[#allocation7 + $0xb4] ss:$8 sps:$4 sm:$0xff]   ;;  %v1114_v59 = vld [vmem:[#allocation7 + $0xb0] ss:$8 sps:$4 sm:$0xff]  }
  0x7d   : > { %734 = vmatpush1.bf16.msra.mxu1 %v1090_v29  ;;  %v1115_v60 = vld [vmem:[#allocation7 + $0xc4] ss:$8 sps:$4 sm:$0xff]   ;;  %v1117_v61 = vld [vmem:[#allocation7 + $0xc0] ss:$8 sps:$4 sm:$0xff]   ;;  %v1118_v62 = vld [vmem:[#allocation7 + $0xd4] ss:$8 sps:$4 sm:$0xff]  }
  0x7e   : > { %735 = vmatprep.subr.bf16.mxu1 %v1091_v30  ;;  %v1120_v63 = vld [vmem:[#allocation7 + $0xd0] ss:$8 sps:$4 sm:$0xff]   ;;  %v1121_v0 = vld [vmem:[#allocation7 + $0xe4] ss:$8 sps:$4 sm:$0xff]   ;;  %v1123_v1 = vld [vmem:[#allocation7 + $0xe0] ss:$8 sps:$4 sm:$0xff]  }
  0x7f   : > { %489 = vmatpush1.bf16.msra.mxu0 %v1048_v11  ;;  %v1124_v2 = vld [vmem:[#allocation7 + $0xf4] ss:$8 sps:$4 sm:$0xff]   ;;  %v1126_v3 = vld [vmem:[#allocation7 + $0xf0] ss:$8 sps:$4 sm:$0xff]   ;;  %v309_v5 = vshrl.u32 %v308_v4, 7  ;;  %s789_s7 = sshll.u32 %s269_s28, 4  ;;  %s1532_s7 = int_to_ptr.vmem [resolvable:$true] %s789_s7 }
  0x80   : > { %490 = vmatprep.subr.bf16.mxu0 %v1049_v12  ;;  %v306_v7 = vld [vmem:[%s1576_s2] sm:$0x3]  ;;  %s775_s22 = scalar_lea.sflag [#allocation4], %s1490_s12  ;;  %s1213_s16 = scalar_lea.vmem %s1532_s7, 256 }
  0x81   : > { %736 = vmatpush1.bf16.msra.mxu1 %v1093_v33  ;;  %v310_v6 = vsub.s32 0, %v309_v5  ;;  %v314_v8 = vsub.s32 1, %v309_v5  ;;  %v555_v22 = vld [vmem:[%s1578_s4] sm:$0x3]  ;;  %p1214_p11 = scmp.ne.s32.totalorder %s1532_s7, %s1213_s16  ;;  %p1593_p0 = scmp.ne.s32.totalorder %s1588_s23, 0 }
  0x82   : > { %737 = vmatprep.subr.bf16.mxu1 %v1094_v34  ;;  %s1290_s9 = smov [#allocation8]  }
  0x83   : > { %491 = vmatpush1.bf16.msra.mxu0 %v1051_v13  ;;  %v311_v9 = vrot.slane %v306_v7, %v310_v6  ;;  %v315_v10 = vrot.slane %v306_v7, %v314_v8  ;;  %p1215_p1 = pnand %p1214_p11, %p1593_p0  ;;  %s1217_s13 = sshll.u32 %s1290_s9, 4  ;;  %s1218_s13 = int_to_ptr.vmem [resolvable:$false] %s1217_s13 }
  0x84   : > { %492 = vmatprep.subr.bf16.mxu0 %v1052_v18  ;;  %s1219_s29 = scalar_lea.vmem %s1218_s13, 512  ;;  %p1220_p7 = scmp.lt.s32.totalorder %s1532_s7, %s1218_s13 }
  0x85   : > { %738 = vmatpush1.bf16.msra.mxu1 %v1096_v36  ;;  %p1216_p3 = pneg %p1215_p1  ;;  %p1221_p9 = scmp.lt.s32.totalorder %s1219_s29, %s1213_s16 }
  0x86   : > { %739 = vmatprep.subr.bf16.mxu1 %v1097_v38 }
  0x87   : > { %493 = vmatpush1.bf16.msra.mxu0 %v1054_v20  ;;  %p1222_p12 = por %p1221_p9, %p1220_p7 }
  0x88   : > { %494 = vmatprep.subr.bf16.mxu0 %v1055_v23  ;;  %v560_v23 = vrot.slane %v555_v22, %v310_v6 }
  0x89   : > { %740 = vmatpush1.bf16.msra.mxu1 %v1099_v40  ;;  %p1223_p2 = pnand %p1222_p12, %p1216_p3 }
  0x8a   : > { %741 = vmatprep.subr.bf16.mxu1 %v1100_v42 }
  0x8b   : > { %495 = vmatpush1.bf16.msra.mxu0 %v1057_v24  ;;  %v564_v24 = vrot.slane %v555_v22, %v314_v8 }
  0x8c   : > { %496 = vmatprep.subr.bf16.mxu0 %v1058_v27 }
  0x8d   : > { %742 = vmatpush1.bf16.msra.mxu1 %v1102_v44 }
  0x8e   : > { %743 = vmatprep.subr.bf16.mxu1 %v1103_v46 }
  0x8f   : > { %497 = vmatpush1.bf16.msra.mxu0 %v1060_v28 }
  0x90   : > { %498 = vmatprep.subr.bf16.mxu0 %v1061_v31 }
  0x91   : > { %744 = vmatpush1.bf16.msra.mxu1 %v1105_v48 }
  0x92   : > { %745 = vmatprep.subr.bf16.mxu1 %v1106_v50 }
  0x93   : > { %499 = vmatpush1.bf16.msra.mxu0 %v1063_v32 }
  0x94   : > { %500 = vmatprep.subr.bf16.mxu0 %v1064_v35 }
  0x95   : > { %746 = vmatpush1.bf16.msra.mxu1 %v1108_v52 }
  0x96   : > { %747 = vmatprep.subr.bf16.mxu1 %v1109_v55 }
  0x97   : > { %501 = vmatpush1.bf16.msra.mxu0 %v1066_v37 }
  0x98   : > { %502 = vmatprep.subr.bf16.mxu0 %v1067_v39 }
  0x99   : > { %748 = vmatpush1.bf16.msra.mxu1 %v1111_v57 }
  0x9a   : > { %749 = vmatprep.subr.bf16.mxu1 %v1112_v58 }
  0x9b   : > { %503 = vmatpush1.bf16.msra.mxu0 %v1069_v41 }
  0x9c   : > { %504 = vmatprep.subr.bf16.mxu0 %v1070_v43 }
  0x9d   : > { %750 = vmatpush1.bf16.msra.mxu1 %v1114_v59 }
  0x9e   : > { %751 = vmatprep.subr.bf16.mxu1 %v1115_v60 }
  0x9f   : > { %505 = vmatpush1.bf16.msra.mxu0 %v1072_v45 }
  0xa0   : > { %506 = vmatprep.subr.bf16.mxu0 %v1073_v47 }
  0xa1   : > { %752 = vmatpush1.bf16.msra.mxu1 %v1117_v61 }
  0xa2   : > { %753 = vmatprep.subr.bf16.mxu1 %v1118_v62 }
  0xa3   : > { %507 = vmatpush1.bf16.msra.mxu0 %v1075_v49 }
  0xa4   : > { %508 = vmatprep.subr.bf16.mxu0 %v1076_v51 }
  0xa5   : > { %754 = vmatpush1.bf16.msra.mxu1 %v1120_v63 }
  0xa6   : > { %755 = vmatprep.subr.bf16.mxu1 %v1121_v0 }
  0xa7   : > { %509 = vmatpush1.bf16.msra.mxu0 %v1078_v53 }
  0xa9   : > { %756 = vmatpush1.bf16.msra.mxu1 %v1123_v1 }
  0xaa   : > { %511 = vmatmul.mubr.bf16.vlgmr.msra.gmra.mrb[0].mxu0 %v272_v56  ;;  %757 = vmatprep.subr.bf16.mxu1 %v1124_v2 }
  0xad   : > { %758 = vmatpush1.bf16.msra.mxu1 %v1126_v3 }
 0x17d   : > { %v512_v11 = vpop.f32.mrb[0].mxu0 }
 0x17e   : > { %v513_v12 = vadd.f32 %v512_v11, %v311_v9  ;;  %v514_v13 = vpop.f32.mrb[1].mxu0 }
 0x17f   : > { %v515_v15 = vadd.f32 %v514_v13, %v315_v10  ;;  %v516_v16 = vpop.f32.mrb[2].mxu0 }
 0x180   : > { %v519_v17 = vmax.f32 %v513_v12, 0.0  ;;  %v517_v18 = vpop.f32.mrb[3].mxu0 }
 0x181   : > { %v520_v19 = vmax.f32 %v515_v15, 0.0 }
 0x182   : > { %v521_v21 = vpack.c.bf16 %v519_v17, %v519_v17 }
 0x183   : > { %v522_v20 = vpack.c.bf16 %v520_v19, %v520_v19 }
 0x185   : > { %759 = vmatprep.mubr.bf16.mxu1 %v522_v20 }
 0x186   : > { %760 = vmatmul.mubr.bf16.vlgmr.msra.gmra.mrb[0].mxu1 %v521_v21 }
 0x259   : > { %v761_v25 = vpop.f32.mrb[0].mxu1 }
 0x25a   : > { %v762_v26 = vadd.f32 %v761_v25, %v560_v23  ;;  %v763_v27 = vpop.f32.mrb[1].mxu1 }
 0x25b   : > { %v764_v28 = vadd.f32 %v763_v27, %v564_v24  ;;  %v765_v29 = vpop.f32.mrb[2].mxu1 }
 0x25c   : > { %v768_v30 = vmax.f32 %v762_v26, 0.0  ;;  %v766_v31 = vpop.f32.mrb[3].mxu1 }
 0x25d   : > { %v769_v32 = vmax.f32 %v764_v28, 0.0 }
 0x25e   : > { %v770_v33 = vadd.f32 %v768_v30, %v1512_v54 }
 0x25f   : > { %v771_v34 = vadd.f32 %v769_v32, %v1507_v14 }
 0x260   : > { %772 = vst [vmem:[%s269_s28] sm:$0xff] %v770_v33 }
 0x261   : > { %773 = vst [vmem:[%s269_s28 + $0x8] sm:$0xff] %v771_v34 }
 0x262   : > { %1226 = shalt.err (!%p1223_p2)
}
 0x263   : > { %s1227_s12 = scalar_lea.hbm %s1530_s15, 256  ;;  %s1231_s26 = scalar_lea.hbm %s1579_s5, 512 }
 0x264   : > { %p1228_p13 = scmp.ne.s32.totalorder %s1530_s15, %s1227_s12  ;;  %p1232_p4 = scmp.lt.u32.totalorder %s1530_s15, %s1579_s5 }
 0x265   : > { %p1233_p5 = scmp.lt.u32.totalorder %s1231_s26, %s1227_s12  ;;  %p1235_p11 = scmp.lt.u32.totalorder %s1227_s12, %s1530_s15 }
 0x266   : > { %p1229_p6 = pnand %p1228_p13, %p1593_p0 }
 0x267   : > { %p1234_p8 = por %p1233_p5, %p1232_p4 }
 0x268   : > { %p1230_p10 = pneg %p1229_p6 }
 0x269   : > { %p1236_p1 = por %p1235_p11, %p1234_p8 }
 0x26b   : > { %p1237_p3 = pnand %p1236_p1, %p1230_p10 }
 0x26d   : > { %1240 = shalt.err (!%p1237_p3)
}
 0x26e   : > { %972 = dma.vmem_to_hbm [thread:$0]  (%p1593_p0), %s1532_s7, 256, %s1530_s15, %s775_s22  }
 0x26f PF: > { %s801_s11 = sand.u32 1, %s1271_s18   ;;  %p1594_p7 = scmp.ne.s32.totalorder %s1584_s25, 0 }
 0x270   : > { %p1595_p9 = scmp.ge.s32.totalorder %s1283_s21, 2  ;;  %s802_s28 = scalar_lea.sflag [#allocation4], %s801_s11 }
 0x272   : > { %p986_p12 = pnand %p1595_p9, %p1594_p7 }
 0x274   : > { %1266 = dma.done.wait (!%p986_p12), %s802_s28, 256  }
 0x275   : > { %1268 = vsyncadd (!%p986_p12), %s802_s28, 4294967040  ;;  %p19_p2 = scmp.ge.s32.totalorder %s1431_s14, 4   ;;  %s1596_s18 = smov %s1275_s19 }
 0x276   : > { %s1597_s19 = smov %s1279_s20  ;;  %s1598_s20 = smov %s1447_s27 }
 0x277   : > { %s1599_s21 = smov %s1431_s14  ;;  %21 = sbr.rel (!%p19_p2) target bundleno = 6 (0x6), region = 93 }
 0x27e   :  { %807 = vsyncpa [#allocation3], 1 }
 0x27f   :  { %809 = vsyncpa [#allocation3 + $0x1], 1 }
 0x280   :  { %810 = vsyncpa [#allocation6], 1 }
 0x281   :  { %811 = vsyncpa [#allocation4], 1 }
 0x282   :  { %813 = vsyncpa [#allocation4 + $0x1], 1 }

</bundles_post_ra>
